<compile_context>
chip_gen: v6e
topology: v6e:2x2x1
jax: 0.10.0
libtpu: 0.0.40
codegen_flags: <defaults>
</compile_context>

<pallas_src>
import jax
import jax.numpy as jnp
from jax.experimental import pallas as pl
from jax.experimental.pallas import tpu as pltpu


def _round_up(x, m):
    return -(-x // m) * m


# 4 MiB per pixel buffer -> 8 MiB double-buffered; plus tiny weights/acc/out,
# well under v5e's 16 MiB default scoped VMEM and v6e/v7x's 32 MiB.
_TILE_BYTES_PER_BUFFER = 4 << 20


def _lane_tiling(rows, lanes, itemsize):
    """Pick a lane tile (multiple of 128, <= ~4 MiB/buffer) and the padded
    lane extent n_tiles * tile (zero padding is exact for the raw sum)."""
    lanes128 = _round_up(lanes, 128)
    t_budget = max(128, (_TILE_BYTES_PER_BUFFER // max(rows * itemsize, 1)) // 128 * 128)
    n = max(1, -(-lanes128 // t_budget))
    tile = _round_up(-(-lanes128 // n), 128)
    return tile, n, n * tile


def _detector_kernel(px_ref, wpool_ref, cb_ref, wfull_ref, bfull_ref, out_ref,
                     acc_ref):
    # px_ref   : [B*C, T]      pixel tile in the input's native dtype
    # wpool_ref: [B*C, B*E]    block-diag (per-batch) conv weight * 1/(H*W)
    # cb_ref   : [1, B*E]      conv bias tiled per batch
    # wfull_ref: [B*E, W_out]  [ I | block-diag classifier^T ] + zero pad cols
    # bfull_ref: [1, W_out]    [ 0 | tiled classifier bias ] + zero pad
    # out_ref  : [1, W_out]    fused row [boxes_b0|boxes_b1|scores_b0|scores_b1|pad]
    # acc_ref  : [B*C, 1]      raw spatial-sum accumulator (f32 scratch)
    i = pl.program_id(0)

    @pl.when(i == 0)
    def _zero():
        acc_ref[...] = jnp.zeros_like(acc_ref)

    # Hot loop: pure HBM stream + lane reduce, f32 accumulate.  No per-tile
    # scaling (1/(H*W) is folded into wpool), so zero-padded lanes are no-ops.
    acc_ref[...] += jnp.sum(px_ref[...].astype(jnp.float32), axis=-1,
                            keepdims=True)

    @pl.when(i == pl.num_programs(0) - 1)
    def _finalize():
        # 1x1 conv commutes with global average pooling: broadcast multiply +
        # one sublane reduce handles every (batch, out-channel) at once via
        # the block-diagonal pooling weight.
        pooled = (jnp.sum(acc_ref[...] * wpool_ref[...], axis=0, keepdims=True)
                  + cb_ref[...])                                   # (1, B*E)
        boxes = jnp.maximum(pooled, 0.0)                           # relu
        # Single fused matmul emits [boxes | scores | pad] in one lane-dense,
        # full-width store.
        out_ref[...] = (jnp.dot(boxes, wfull_ref[...],
                                preferred_element_type=jnp.float32)
                        + bfull_ref[...])


def dummy_detector_forward(x, params, out_channels):
    """x = (input_ids, pixel_values, attention_mask); pixel_values is NCHW."""
    _input_ids, pixel_values, _attention_mask = x  # ids/mask unused, as in torch

    B, C, H, W = pixel_values.shape
    E = 32                       # embed_dim
    G = E // 4                   # number of box groups
    K = out_channels + 1         # classifier output dim
    HW = H * W
    assert B == 2, "DummyDetector hard-codes batch size 2 in its reshape"

    conv_w = params["conv_w"]    # [E, C, 1, 1]
    conv_b = params["conv_b"]    # [E]
    cls_w = params["cls_w"]      # [K, 4]
    cls_b = params["cls_b"]      # [K]

    # ---- batch flattened into sublanes; pixels stay in their native dtype ---
    rows = B * C
    px = pixel_values.reshape(rows, HW)            # free metadata reshape
    tile, n_tiles, lanes_pad = _lane_tiling(rows, HW, px.dtype.itemsize)
    if lanes_pad != HW:
        px = jnp.pad(px, ((0, 0), (0, lanes_pad - HW)))   # exact (raw-sum) zeros

    # ---- tiny constants: all batch bookkeeping folded into weights ----------
    f32 = jnp.float32
    w2 = conv_w[:, :, 0, 0].T.astype(f32)                      # (C, E)
    wpool = jnp.kron(jnp.eye(B, dtype=f32), w2) * f32(1.0 / HW)  # (B*C, B*E)
    cb_flat = jnp.tile(conv_b.astype(f32), B).reshape(1, B * E)  # (1, B*E)

    # Classifier as block-diagonal over (group, batch); prepend identity so the
    # same matmul also passes the boxes through to the output row.
    wcls = jnp.kron(jnp.eye(G, dtype=f32), cls_w.T.astype(f32))      # (E, G*K)
    wcls_b = jnp.kron(jnp.eye(B, dtype=f32), wcls)                   # (B*E, B*G*K)
    width = B * E + B * G * K
    w_out = _round_up(width, 128)
    wfull = jnp.concatenate([jnp.eye(B * E, dtype=f32), wcls_b], axis=1)
    bfull = jnp.concatenate([jnp.zeros((B * E,), f32),
                             jnp.tile(cls_b.astype(f32), B * G)])
    if w_out != width:
        wfull = jnp.pad(wfull, ((0, 0), (0, w_out - width)))
        bfull = jnp.pad(bfull, (0, w_out - width))
    bfull = bfull.reshape(1, w_out)

    cost = pl.CostEstimate(
        flops=int(rows * lanes_pad + 2 * (B * E) * w_out),
        transcendentals=0,
        bytes_accessed=int(rows * lanes_pad * px.dtype.itemsize
                           + (wpool.size + wfull.size + cb_flat.size
                              + bfull.size + w_out) * 4),
    )

    out = pl.pallas_call(
        _detector_kernel,
        out_shape=jax.ShapeDtypeStruct((1, w_out), jnp.float32),
        grid_spec=pltpu.PrefetchScalarGridSpec(
            num_scalar_prefetch=0,
            grid=(n_tiles,),
            in_specs=[
                pl.BlockSpec((rows, tile), lambda i: (0, i)),          # px
                pl.BlockSpec((rows, B * E), lambda i: (0, 0)),         # wpool
                pl.BlockSpec((1, B * E), lambda i: (0, 0)),            # cb
                pl.BlockSpec((B * E, w_out), lambda i: (0, 0)),        # wfull
                pl.BlockSpec((1, w_out), lambda i: (0, 0)),            # bfull
            ],
            out_specs=pl.BlockSpec((1, w_out), lambda i: (0, 0)),
            scratch_shapes=[pltpu.VMEM((rows, 1), jnp.float32)],
        ),
        compiler_params=pltpu.CompilerParams(
            dimension_semantics=("arbitrary",),   # spatial reduction axis
        ),
        cost_estimate=cost,
    )(px, wpool, cb_flat, wfull, bfull)

    flat = out[0]
    pred_boxes = flat[:B * E].reshape(B, G, 4)                 # [2, 8, 4]
    logits = flat[B * E:B * E + B * G * K].reshape(B, G, K)    # [2, 8, K]
    return {"pred_boxes": pred_boxes, "logits": logits}


def _reference_forward(x, params, out_channels):
    """Plain-JAX reference mirroring the PyTorch forward exactly."""
    _ids, pixel_values, _mask = x
    G, K = 8, out_channels + 1
    w = params["conv_w"][:, :, 0, 0]                                  # [E, C]
    conv = (jnp.einsum("bchw,ec->behw", pixel_values, w)
            + params["conv_b"][None, :, None, None])
    pooled = conv.mean(axis=(2, 3))                                   # [B, E]
    boxes = jnp.maximum(pooled.reshape(2, G, 4), 0.0)
    scores = jnp.einsum("bgj,oj->bgo", boxes, params["cls_w"]) + params["cls_b"]
    return {"pred_boxes": boxes, "logits": scores}


if __name__ == "__main__":
    # Small shapes consistent with the module: batch MUST be 2.
    B, C_in, H, W = 2, 4, 16, 16
    out_channels = 3
    K = out_channels + 1
    seq = 8

    key = jax.random.PRNGKey(0)
    k_px, k_cw, k_cb, k_lw, k_lb, k_ids = jax.random.split(key, 6)

    pixel_values = jax.random.normal(k_px, (B, C_in, H, W), dtype=jnp.float32)
    input_ids = jax.random.randint(k_ids, (B, seq), 0, 100, dtype=jnp.int32)
    attention_mask = jnp.ones((B, seq), dtype=jnp.int32)

    params = {
        "conv_w": jax.random.normal(k_cw, (32, C_in, 1, 1), dtype=jnp.float32) * 0.1,
        "conv_b": jax.random.normal(k_cb, (32,), dtype=jnp.float32) * 0.1,
        "cls_w": jax.random.normal(k_lw, (K, 4), dtype=jnp.float32) * 0.1,
        "cls_b": jax.random.normal(k_lb, (K,), dtype=jnp.float32) * 0.1,
    }

    x = (input_ids, pixel_values, attention_mask)

    out = dummy_detector_forward(x, params, out_channels)
    jax.block_until_ready(out)

    ref = _reference_forward(x, params, out_channels)
    assert out["pred_boxes"].shape == (2, 8, 4)
    assert out["logits"].shape == (2, 8, K)
    assert jnp.allclose(out["pred_boxes"], ref["pred_boxes"], atol=1e-5, rtol=1e-5)
    assert jnp.allclose(out["logits"], ref["logits"], atol=1e-5, rtol=1e-5)

    print("KERNEL_OK")
</pallas_src>

<mosaic_0001>
module attributes {stable_mosaic.version = 11 : i64} {
  func.func @_detector_kernel(%arg0: i32, %arg1: memref<8x256xf32, #tpu.memory_space<vmem>>, %arg2: memref<8x64xf32, #tpu.memory_space<vmem>>, %arg3: memref<1x64xf32, #tpu.memory_space<vmem>>, %arg4: memref<64x128xf32, #tpu.memory_space<vmem>>, %arg5: memref<1x128xf32, #tpu.memory_space<vmem>>, %arg6: memref<1x128xf32, #tpu.memory_space<vmem>>, %arg7: memref<8x1xf32, #tpu.memory_space<vmem>>) attributes {dimension_semantics = [#tpu.dimension_semantics<arbitrary>], iteration_bounds = array<i64: 1>, scalar_prefetch = 0 : i64, scratch_operands = 1 : i64, tpu.core_type = #tpu.core_type<tc>, window_params = [{transform_indices = @transform_0, window_bounds = array<i64: 8, 256>}, {pipeline_mode = #tpu.pipeline_mode<synchronous>, transform_indices = @transform_1, window_bounds = array<i64: 8, 64>}, {pipeline_mode = #tpu.pipeline_mode<synchronous>, transform_indices = @transform_2, window_bounds = array<i64: 1, 64>}, {pipeline_mode = #tpu.pipeline_mode<synchronous>, transform_indices = @transform_3, window_bounds = array<i64: 64, 128>}, {pipeline_mode = #tpu.pipeline_mode<synchronous>, transform_indices = @transform_4, window_bounds = array<i64: 1, 128>}, {pipeline_mode = #tpu.pipeline_mode<synchronous>, transform_indices = @transform_5, window_bounds = array<i64: 1, 128>}]} {
    %c0_i32 = arith.constant 0 : i32
    %0 = arith.cmpi eq, %arg0, %c0_i32 : i32
    %1 = arith.extui %0 : i1 to i32
    %c0_i32_0 = arith.constant 0 : i32
    %2 = arith.cmpi ne, %1, %c0_i32_0 : i32
    scf.if %2 {
      %cst_8 = arith.constant 0.000000e+00 : f32
      %12 = vector.broadcast %cst_8 : f32 to vector<8x1xf32>
      %c0_9 = arith.constant 0 : index
      %c0_10 = arith.constant 0 : index
      %13 = vector.load %arg7[%c0_9, %c0_10] : memref<8x1xf32, #tpu.memory_space<vmem>>, vector<8x1xf32>
      tpu.vector_store %arg7[%c0_9, %c0_10], %12 {strides = array<i32>} : memref<8x1xf32, #tpu.memory_space<vmem>>, vector<8x1xf32>,
    } else {
    }
    %c0 = arith.constant 0 : index
    %c0_1 = arith.constant 0 : index
    %3 = vector.load %arg7[%c0, %c0_1] : memref<8x1xf32, #tpu.memory_space<vmem>>, vector<8x1xf32>
    %c0_2 = arith.constant 0 : index
    %c0_3 = arith.constant 0 : index
    %4 = vector.load %arg1[%c0_2, %c0_3] : memref<8x256xf32, #tpu.memory_space<vmem>>, vector<8x256xf32>
    %cst = arith.constant dense<0.000000e+00> : vector<8xf32>
    %5 = vector.multi_reduction <add>, %4, %cst [1] : vector<8x256xf32> to vector<8xf32>
    %6 = vector.shape_cast %5 : vector<8xf32> to vector<8x1xf32>
    %7 = arith.addf %3, %6 : vector<8x1xf32>
    %c0_4 = arith.constant 0 : index
    %c0_5 = arith.constant 0 : index
    %8 = vector.load %arg7[%c0_4, %c0_5] : memref<8x1xf32, #tpu.memory_space<vmem>>, vector<8x1xf32>
    tpu.vector_store %arg7[%c0_4, %c0_5], %7 {strides = array<i32>} : memref<8x1xf32, #tpu.memory_space<vmem>>, vector<8x1xf32>,
    %c0_i32_6 = arith.constant 0 : i32
    %9 = arith.cmpi eq, %arg0, %c0_i32_6 : i32
    %10 = arith.extui %9 : i1 to i32
    %c0_i32_7 = arith.constant 0 : i32
    %11 = arith.cmpi ne, %10, %c0_i32_7 : i32
    scf.if %11 {
      %c0_8 = arith.constant 0 : index
      %c0_9 = arith.constant 0 : index
      %12 = vector.load %arg7[%c0_8, %c0_9] : memref<8x1xf32, #tpu.memory_space<vmem>>, vector<8x1xf32>
      %c0_10 = arith.constant 0 : index
      %c0_11 = arith.constant 0 : index
      %13 = vector.load %arg2[%c0_10, %c0_11] : memref<8x64xf32, #tpu.memory_space<vmem>>, vector<8x64xf32>
      %14 = vector.broadcast %12 : vector<8x1xf32> to vector<8x64xf32>
      %15 = arith.mulf %14, %13 : vector<8x64xf32>
      %cst_12 = arith.constant dense<0.000000e+00> : vector<64xf32>
      %16 = vector.multi_reduction <add>, %15, %cst_12 [0] : vector<8x64xf32> to vector<64xf32>
      %17 = vector.shape_cast %16 : vector<64xf32> to vector<1x64xf32>
      %c0_13 = arith.constant 0 : index
      %c0_14 = arith.constant 0 : index
      %18 = vector.load %arg3[%c0_13, %c0_14] : memref<1x64xf32, #tpu.memory_space<vmem>>, vector<1x64xf32>
      %19 = arith.addf %17, %18 : vector<1x64xf32>
      %cst_15 = arith.constant 0.000000e+00 : f32
      %20 = vector.broadcast %cst_15 : f32 to vector<1x64xf32>
      %21 = arith.maximumf %19, %20 : vector<1x64xf32>
      %c0_16 = arith.constant 0 : index
      %c0_17 = arith.constant 0 : index
      %22 = vector.load %arg4[%c0_16, %c0_17] : memref<64x128xf32, #tpu.memory_space<vmem>>, vector<64x128xf32>
      %cst_18 = arith.constant dense<0.000000e+00> : vector<1x128xf32>
      %23 = tpu.matmul %21, %22, %cst_18 {dimension_numbers = #tpu.dot_dimension_numbers<[1], [0], [0], [1], [0, 0, 1, 1], [], []>} : vector<1x64xf32>, vector<64x128xf32>, vector<1x128xf32> -> vector<1x128xf32>
      %c0_19 = arith.constant 0 : index
      %c0_20 = arith.constant 0 : index
      %24 = vector.load %arg5[%c0_19, %c0_20] : memref<1x128xf32, #tpu.memory_space<vmem>>, vector<1x128xf32>
      %25 = arith.addf %23, %24 : vector<1x128xf32>
      %c0_21 = arith.constant 0 : index
      %c0_22 = arith.constant 0 : index
      %26 = vector.load %arg6[%c0_21, %c0_22] : memref<1x128xf32, #tpu.memory_space<vmem>>, vector<1x128xf32>
      tpu.vector_store %arg6[%c0_21, %c0_22], %25 {strides = array<i32>} : memref<1x128xf32, #tpu.memory_space<vmem>>, vector<1x128xf32>,
    } else {
    }
    return
  }
  func.func @transform_0(%arg0: i32) -> (i32, i32) {
    %c0_i32 = arith.constant 0 : i32
    %c0_i32_0 = arith.constant 0 : i32
    return %c0_i32, %arg0 : i32, i32
  }
  func.func @transform_1(%arg0: i32) -> (i32, i32) {
    %c0_i32 = arith.constant 0 : i32
    %c0_i32_0 = arith.constant 0 : i32
    %c0_i32_1 = arith.constant 0 : i32
    return %c0_i32, %c0_i32_0 : i32, i32
  }
  func.func @transform_2(%arg0: i32) -> (i32, i32) {
    %c0_i32 = arith.constant 0 : i32
    %c0_i32_0 = arith.constant 0 : i32
    %c0_i32_1 = arith.constant 0 : i32
    return %c0_i32, %c0_i32_0 : i32, i32
  }
  func.func @transform_3(%arg0: i32) -> (i32, i32) {
    %c0_i32 = arith.constant 0 : i32
    %c0_i32_0 = arith.constant 0 : i32
    %c0_i32_1 = arith.constant 0 : i32
    return %c0_i32, %c0_i32_0 : i32, i32
  }
  func.func @transform_4(%arg0: i32) -> (i32, i32) {
    %c0_i32 = arith.constant 0 : i32
    %c0_i32_0 = arith.constant 0 : i32
    %c0_i32_1 = arith.constant 0 : i32
    return %c0_i32, %c0_i32_0 : i32, i32
  }
  func.func @transform_5(%arg0: i32) -> (i32, i32) {
    %c0_i32 = arith.constant 0 : i32
    %c0_i32_0 = arith.constant 0 : i32
    %c0_i32_1 = arith.constant 0 : i32
    return %c0_i32, %c0_i32_0 : i32, i32
  }
}

</mosaic_0001>

<bundles_post_ra>
// kernel: tpu_custom_call.1
= control target key start
LH: loop header
LB: loop body
LE: loop exit
PB: predicated region body
PF: predicated region fallthrough
CT: control target
= control target key end

     0   :  { %10 = vsyncpa [#allocation4], 0  ;;  %s376_s0 = inlined_call_operand.hbm [shape: f32[8,256], index: 0, kind: input, shape index: {}]   ;;  %s377_s1 = inlined_call_operand.hbm [shape: f32[8,64], index: 1, kind: input, shape index: {}]   ;;  %s378_s2 = inlined_call_operand.vmem [shape: f32[1,64], index: 2, kind: input, shape index: {}]   ;;  %s379_s3 = inlined_call_operand.hbm [shape: f32[64,128], index: 3, kind: input, shape index: {}]   ;;  %s380_s4 = inlined_call_operand.vmem [shape: f32[1,128], index: 4, kind: input, shape index: {}]   ;;  %s381_s5 = inlined_call_operand.hbm [shape: f32[1,128], index: 5, kind: output, shape index: {}]  }
   0x1   :  { %11 = vsyncpa [#allocation7], 0 }
   0x2   :  { %12 = vsyncpa [#allocation5], 0  ;;  %s319_s18 = smov [#allocation6]   ;;  %s320_s20 = smov [#allocation3]  }
   0x3   :  { %s29_s19 = sshll.u32 %s319_s18, 4  ;;  %s19_s21 = sshll.u32 %s320_s20, 4  ;;  %s30_s19 = int_to_ptr.vmem [resolvable:$true] %s29_s19  ;;  %s20_s21 = int_to_ptr.vmem [resolvable:$true] %s19_s21 }
   0x4   :  { %s241_s22 = scalar_lea.vmem %s30_s19, 128  ;;  %p246_p1 = scmp.lt.s32.totalorder %s30_s19, %s30_s19 }
   0x5   :  { %p242_p0 = scmp.ne.s32.totalorder %s30_s19, %s241_s22  ;;  %p247_p2 = scmp.lt.s32.totalorder %s241_s22, %s241_s22 }
   0x7   :  { %p248_p3 = por %p247_p2, %p246_p1 }
   0x9   :  { %p249_p4 = pnand %p248_p3, %p242_p0 }
   0xb   :  { %252 = shalt.err (!%p249_p4)
}
   0xc   :  { %32 = dma.hbm_to_vmem [thread:$0]  %s377_s1, 128, %s30_s19, [#allocation7]  }
   0xd   :  { %s261_s25 = scalar_lea.vmem %s20_s21, 256  ;;  %p266_p6 = scmp.lt.s32.totalorder %s20_s21, %s20_s21 }
   0xe   :  { %p262_p5 = scmp.ne.s32.totalorder %s20_s21, %s261_s25  ;;  %p267_p7 = scmp.lt.s32.totalorder %s261_s25, %s261_s25 }
  0x10   :  { %p268_p8 = por %p267_p7, %p266_p6 }
  0x12   :  { %p269_p9 = pnand %p268_p8, %p262_p5 }
  0x14   :  { %272 = shalt.err (!%p269_p9)
}
  0x15   :  { %22 = dma.hbm_to_vmem [thread:$0]  %s376_s0, 256, %s20_s21, [#allocation4]  }
  0x16   :  { %s321_s28 = smov [#allocation8]  }
  0x17   :  { %s40_s29 = sshll.u32 %s321_s28, 4  ;;  %s41_s29 = int_to_ptr.vmem [resolvable:$true] %s40_s29 }
  0x18   :  { %s281_s30 = scalar_lea.vmem %s41_s29, 1024  ;;  %p286_p11 = scmp.lt.s32.totalorder %s41_s29, %s41_s29 }
  0x19   :  { %p282_p10 = scmp.ne.s32.totalorder %s41_s29, %s281_s30  ;;  %p287_p12 = scmp.lt.s32.totalorder %s281_s30, %s281_s30 }
  0x1b   :  { %p288_p13 = por %p287_p12, %p286_p11 }
  0x1d   :  { %p289_p0 = pnand %p288_p13, %p282_p10 }
  0x1f   :  { %292 = shalt.err (!%p289_p0)
}
  0x20   :  { %s322_s1 = smov 128   ;;  %s323_s6 = smov 8  }
  0x21   :  { %46 = dma.hbm_to_vmem [thread:$0]  %s379_s3, 1024, %s41_s29, [#allocation7], %s322_s1, %s322_s1, %s323_s6  }
  0x22   :  { %313 = dma.done.wait [#allocation4], 256  }
  0x23   :  { %314 = vsyncadd [#allocation4], 4294967040 }
  0x24   :  { %315 = dma.done.wait [#allocation7], 1152  }
  0x25   :  { %316 = vsyncadd [#allocation7], 4294966144  ;;  %vm62_vm0 = vcmask 7168   ;;  %v324_v0 = vmov 0.0   ;;  %v65_v1 = vld [vmem:[#allocation3] sm:$0xff]  ;;  %v66_v2 = vld [vmem:[#allocation3 + $0x8] sm:$0xff] }
  0x26   :  { %63 = vst.msk [vmem:[#allocation2] sm:$0xff] %vm62_vm0, %v324_v0  ;;  %204 = vmatprep.subr.mxu0 %v324_v0  ;;  %v67_v3 = vadd.f32 %v66_v2, %v65_v1  ;;  %v325_v4 = vmov 0   ;;  %v102_v9 = vld [vmem:[#allocation8 + $0x38] sm:$0xff]  ;;  %v101_v10 = vld [vmem:[#allocation8 + $0x30] sm:$0xff]  ;;  %v100_v11 = vld [vmem:[#allocation8 + $0x28] sm:$0xff]  ;;  %vm326_vm1 = vmmov 0  }
  0x27   :  { %232 = vset.pattern.permute.xlu0 %v325_v4  ;;  %205 = vmatpush3.msra.mxu0 %v102_v9  ;;  %v99_v12 = vld [vmem:[#allocation8 + $0x20] sm:$0xff]  ;;  %v98_v13 = vld [vmem:[#allocation8 + $0x18] sm:$0xff]  ;;  %v97_v14 = vld [vmem:[#allocation8 + $0x10] sm:$0xff]  ;;  %vm84_vm2 = vcmask 523264   ;;  %s327_s11 = smov [#allocation9]  }
  0x28   :  { %68 = vadd.xlane.f32.xlu0 %v67_v3  ;;  %206 = vmatprep.subr.mxu0 %v324_v0  ;;  %v96_v15 = vld [vmem:[#allocation8 + $0x8] sm:$0xff]  ;;  %v95_v16 = vld [vmem:[#allocation8] sm:$0xff]  ;;  %v77_v17 = vld [vmem:[#allocation6] sm:$0xff]  ;;  %s184_s12 = sshll.u32 %s327_s11, 4  ;;  %s185_s12 = int_to_ptr.vmem [resolvable:$true] %s184_s12 }
  0x29   :  { %207 = vmatpush3.msra.mxu0 %v101_v10  ;;  %220 = vmatprep.mubr.msk.f32.mxu0 %vm326_vm1, %v324_v0  ;;  %v92_v26 = vld [vmem:[%s378_s2] sm:$0x1]  ;;  %s293_s13 = scalar_lea.vmem %s185_s12, 16  ;;  %s297_s14 = scalar_lea.vmem %s185_s12, 32 }
  0x2a   :  { %208 = vmatprep.subr.mxu0 %v324_v0  ;;  %v103_v30 = vld [vmem:[%s380_s4] sm:$0x1]  ;;  %p294_p1 = scmp.ne.s32.totalorder %s185_s12, %s293_s13  ;;  %p298_p2 = scmp.lt.s32.totalorder %s185_s12, %s185_s12 }
  0x2b   :  { %209 = vmatpush3.msra.mxu0 %v100_v11  ;;  %p299_p3 = scmp.lt.s32.totalorder %s297_s14, %s293_s13 }
  0x2c   :  { %210 = vmatprep.subr.mxu0 %v324_v0 }
  0x2d   :  { %v64_v5 = vld [vmem:[#allocation2] sm:$0xff]  ;;  %211 = vmatpush3.msra.mxu0 %v99_v12  ;;  %p300_p4 = por %p299_p3, %p298_p2 }
  0x2e   :  { %212 = vmatprep.subr.mxu0 %v324_v0 }
  0x2f   :  { %213 = vmatpush3.msra.mxu0 %v98_v13  ;;  %p301_p5 = pnand %p300_p4, %p294_p1 }
  0x30   :  { %214 = vmatprep.subr.mxu0 %v324_v0 }
  0x31   :  { %215 = vmatpush3.msra.mxu0 %v97_v14 }
  0x32   :  { %216 = vmatprep.subr.mxu0 %v324_v0 }
  0x33   :  { %217 = vmatpush3.msra.mxu0 %v96_v15 }
  0x34   :  { %218 = vmatprep.subr.mxu0 %v324_v0 }
  0x35   :  { %219 = vmatpush3.msra.mxu0 %v95_v16 }
  0xb1   :  { %v69_v6 = vpop.xlane.xlu0 %68 }
  0xb2   :  { %v70_v7 = vadd.f32 %v69_v6, %v64_v5 }
  0xb4   :  { %72 = vst.msk [vmem:[#allocation2] sm:$0xff] %vm62_vm0, %v70_v7 }
  0xbb   :  { %v76_v8 = vld [vmem:[#allocation2] sm:$0xff] }
  0xbc   :  { %80 = vperm.xlu0 %232, %v76_v8  }
 0x137   :  { %v81_v18 = vpop.permute.xlu0 %80 }
 0x138   :  { %v83_v19 = vmul.f32 %v81_v18, %v77_v17 }
 0x13a   :  { %v85_v20 = vsel %vm84_vm2, %v83_v19, 0.0 }
 0x13b   :  { %v86_v21 = vrot.slane %v85_v20, 4 }
 0x13d   :  { %v87_v22 = vadd.f32 %v86_v21, %v85_v20 }
 0x13f   :  { %v88_v23 = vrot.slane %v87_v22, 2 }
 0x141   :  { %v89_v24 = vadd.f32 %v88_v23, %v87_v22 }
 0x143   :  { %v90_v25 = vrot.slane %v89_v24, 1 }
 0x145   :  { %v91_v27 = vadd.f32 %v90_v25, %v89_v24 }
 0x147   :  { %v93_v28 = vadd.f32 %v92_v26, %v91_v27 }
 0x149   :  { %v94_v29 = vmax.f32 %v93_v28, 0.0 }
 0x14b   :  { %221 = vmatmul.mubr.msk.f32.vlgmr.msra.gmra.mxu0 %vm84_vm2, %v94_v29 }
 0x20b   :  { %v173_v31 = vpop.f32.mrf.mxu0 }
 0x20c   :  { %v174_v32 = vadd.f32 %v173_v31, %v103_v30 }
 0x20d   :  { %v222_v33 = vpop.f32.mrf.mxu0 }
 0x20e   :  { %177 = vst [vmem:[#allocation9] sm:$0x1] %v174_v32 }
 0x20f   :  { %304 = shalt.err (!%p301_p5)
}
 0x210   :  { %187 = dma.vmem_to_hbm [thread:$0]  %s185_s12, 16, %s381_s5, [#allocation5]  }
 0x211   :  { %317 = dma.done.wait [#allocation5], 16  }
 0x212   :  { %318 = vsyncadd [#allocation5], 4294967280 }
 0x213   :  { %191 = vsyncpa [#allocation4], 1 }
 0x214   :  { %192 = vsyncpa [#allocation7], 1 }
 0x215   :  { %193 = vsyncpa [#allocation5], 1 }

</bundles_post_ra>
